<compile_context>
chip_gen: v7x
topology: tpu7x:2x2x1
jax: 0.10.0
libtpu: 0.0.40
codegen_flags: <defaults>
</compile_context>

<pallas_src>
import functools

import jax
import jax.numpy as jnp
from jax.experimental import pallas as pl
from jax.experimental.pallas import tpu as pltpu

DROPOUT_RATE = 0.1       # unused at inference time
EMBEDDING_SIZE = 64
TM_MAX = 4096            # packed rows per tile; fits default scoped VMEM on all chips


def _round_up(n, m):
    return ((n + m - 1) // m) * m


def _default_pack():
    """Tokens packed per row: 4 on 256-wide MXUs (v6e/v7x), 2 on 128-wide (v5e).

    Prefer the Pallas hardware query; fall back to device_kind.  Pass `pack`
    explicitly to pack_ffn_params() under AOT compile / multi-backend hosts.
    """
    name = ""
    try:
        info = pltpu.get_tpu_info()
        name = str(getattr(info, "chip_version", "") or "")
    except Exception:
        name = ""
    if not name:
        try:
            name = jax.devices()[0].device_kind
        except Exception:
            name = ""
    name = name.lower()
    if "v6" in name or "v7" in name or "trillium" in name:
        return 4
    return 2


def _choose_tm(mp, tm_max):
    """Largest multiple-of-8 tile <= min(tm_max, mp); keep >=2 grid steps when
    there is enough work so the parallel axis shards across v7x's 2 TCs."""
    tm = min(tm_max, max(8, (mp // 8) * 8))
    if mp >= 16 and pl.cdiv(mp, tm) < 2:
        tm = max(8, _round_up(pl.cdiv(mp, 2), 8))
    return tm


def pack_ffn_params(w1, b1, w2, b2, *, pack=None):
    """One-time parameter packing (call at parameter-load time, not per step).

    Builds block-diagonal (Dp, Dp) bf16 weights and tiled (1, Dp) f32 biases,
    where Dp = pack * EMBEDDING_SIZE.  Block-diagonal packing is exact.
    """
    if pack is None:
        pack = _default_pack()
    d = w1.shape[0]
    eye = jnp.eye(pack, dtype=jnp.float32)
    w1_bd = jnp.kron(eye, w1.astype(jnp.float32)).astype(jnp.bfloat16)
    w2_bd = jnp.kron(eye, w2.astype(jnp.float32)).astype(jnp.bfloat16)
    b1_p = jnp.tile(b1.astype(jnp.float32), pack).reshape(1, pack * d)
    b2_p = jnp.tile(b2.astype(jnp.float32), pack).reshape(1, pack * d)
    return w1_bd, b1_p, w2_bd, b2_p


def ffn_kernel(x_ref, w1_ref, b1_ref, w2_ref, b2_ref, o_ref):
    x = x_ref[...]
    # Linear 1 (bf16 MXU operands, f32 accumulate) + bias + ReLU in f32.
    # Dropout layers are identity at inference.
    h = jnp.dot(x.astype(jnp.bfloat16), w1_ref[...],
                preferred_element_type=jnp.float32)
    h = jnp.maximum(h + b1_ref[...], 0.0)
    # Linear 2 + bias.
    y = jnp.dot(h.astype(jnp.bfloat16), w2_ref[...],
                preferred_element_type=jnp.float32)
    o_ref[...] = (y + b2_ref[...]).astype(o_ref.dtype)


@functools.partial(jax.jit, static_argnames=("tm_max",))
def feed_forward(x, w1_bd, b1_p, w2_bd, b2_p, *, tm_max=TM_MAX):
    """x: (batch, seq, 64) -> (batch, seq, 64), using params from pack_ffn_params."""
    B, S, D = x.shape
    assert D == EMBEDDING_SIZE
    Dp = w1_bd.shape[0]
    pack = Dp // D

    # ---- pack `pack` tokens per row (lane-dense layout) -------------------
    M = B * S
    Mp = max(8, pl.cdiv(M, pack))        # >= 8 packed rows (min sublane tile)
    M_pad = Mp * pack                    # pads < pack tokens (plus tiny-input floor)
    x2d = x.reshape(M, D)
    if M_pad != M:
        x2d = jnp.pad(x2d, ((0, M_pad - M), (0, 0)))
    xp = x2d.reshape(Mp, Dp)             # pure bitcast when no pad was needed

    TM = _choose_tm(Mp, tm_max)
    grid = (pl.cdiv(Mp, TM),)            # ragged last block; masked stores

    outp = pl.pallas_call(
        ffn_kernel,
        out_shape=jax.ShapeDtypeStruct((Mp, Dp), x.dtype),
        grid=grid,
        in_specs=[
            pl.BlockSpec((TM, Dp), lambda i: (i, 0)),   # x tile (streamed)
            pl.BlockSpec((Dp, Dp), lambda i: (0, 0)),   # w1 (VMEM resident)
            pl.BlockSpec((1, Dp), lambda i: (0, 0)),    # b1
            pl.BlockSpec((Dp, Dp), lambda i: (0, 0)),   # w2
            pl.BlockSpec((1, Dp), lambda i: (0, 0)),    # b2
        ],
        out_specs=pl.BlockSpec((TM, Dp), lambda i: (i, 0)),
        compiler_params=pltpu.CompilerParams(
            dimension_semantics=("parallel",)),
    )(xp, w1_bd, b1_p, w2_bd, b2_p)

    out2d = outp.reshape(M_pad, D)
    if M_pad != M:
        out2d = out2d[:M]
    return out2d.reshape(B, S, D)


if __name__ == "__main__":
    key = jax.random.PRNGKey(0)
    kx, kw1, kb1, kw2, kb2 = jax.random.split(key, 5)

    batch, seq = 2, 8
    x = jax.random.normal(kx, (batch, seq, EMBEDDING_SIZE), dtype=jnp.float32)

    # Deterministic parameter init (PyTorch-Linear-like uniform bound 1/sqrt(fan_in))
    bound = 1.0 / (EMBEDDING_SIZE ** 0.5)
    w1 = jax.random.uniform(kw1, (EMBEDDING_SIZE, EMBEDDING_SIZE),
                            minval=-bound, maxval=bound, dtype=jnp.float32)
    b1 = jax.random.uniform(kb1, (EMBEDDING_SIZE,),
                            minval=-bound, maxval=bound, dtype=jnp.float32)
    w2 = jax.random.uniform(kw2, (EMBEDDING_SIZE, EMBEDDING_SIZE),
                            minval=-bound, maxval=bound, dtype=jnp.float32)
    b2 = jax.random.uniform(kb2, (EMBEDDING_SIZE,),
                            minval=-bound, maxval=bound, dtype=jnp.float32)

    # One-time packing at parameter-load time (hoisted out of the forward).
    packed = pack_ffn_params(w1, b1, w2, b2)

    out = feed_forward(x, *packed)
    jax.block_until_ready(out)

    # Reference 1: same math (bf16 matmul operands, f32 accumulation) in plain JAX.
    xb = x.reshape(-1, EMBEDDING_SIZE).astype(jnp.bfloat16)
    h_ref = jnp.maximum(
        jnp.dot(xb, w1.astype(jnp.bfloat16), preferred_element_type=jnp.float32)
        + b1, 0.0)
    ref = (jnp.dot(h_ref.astype(jnp.bfloat16), w2.astype(jnp.bfloat16),
                   preferred_element_type=jnp.float32)
           + b2).reshape(batch, seq, EMBEDDING_SIZE)
    assert jnp.allclose(out, ref, atol=5e-3, rtol=5e-3), "mismatch vs bf16 reference"

    # Reference 2: full-f32 math, bf16-level tolerance.
    ref32 = (jnp.maximum(x.reshape(-1, EMBEDDING_SIZE) @ w1 + b1, 0.0) @ w2
             + b2).reshape(batch, seq, EMBEDDING_SIZE)
    assert jnp.allclose(out, ref32, atol=5e-2, rtol=5e-2), "mismatch vs f32 reference"

    print("KERNEL_OK")
</pallas_src>

<mosaic_0001>
module attributes {stable_mosaic.version = 11 : i64} {
  func.func @ffn_kernel(%arg0: i32, %arg1: memref<8x128xf32, #tpu.memory_space<vmem>>, %arg2: memref<128x128xbf16, #tpu.memory_space<vmem>>, %arg3: memref<1x128xf32, #tpu.memory_space<vmem>>, %arg4: memref<128x128xbf16, #tpu.memory_space<vmem>>, %arg5: memref<1x128xf32, #tpu.memory_space<vmem>>, %arg6: memref<8x128xf32, #tpu.memory_space<vmem>>) attributes {dimension_semantics = [#tpu.dimension_semantics<parallel>], iteration_bounds = array<i64: 1>, scalar_prefetch = 0 : i64, scratch_operands = 0 : i64, tpu.core_type = #tpu.core_type<tc>, window_params = [{transform_indices = @transform_0, window_bounds = array<i64: 8, 128>}, {pipeline_mode = #tpu.pipeline_mode<synchronous>, transform_indices = @transform_1, window_bounds = array<i64: 128, 128>}, {pipeline_mode = #tpu.pipeline_mode<synchronous>, transform_indices = @transform_2, window_bounds = array<i64: 1, 128>}, {pipeline_mode = #tpu.pipeline_mode<synchronous>, transform_indices = @transform_3, window_bounds = array<i64: 128, 128>}, {pipeline_mode = #tpu.pipeline_mode<synchronous>, transform_indices = @transform_4, window_bounds = array<i64: 1, 128>}, {transform_indices = @transform_5, window_bounds = array<i64: 8, 128>}]} {
    %c0 = arith.constant 0 : index
    %c0_0 = arith.constant 0 : index
    %0 = vector.load %arg1[%c0, %c0_0] : memref<8x128xf32, #tpu.memory_space<vmem>>, vector<8x128xf32>
    %1 = arith.truncf %0 : vector<8x128xf32> to vector<8x128xbf16>
    %c0_1 = arith.constant 0 : index
    %c0_2 = arith.constant 0 : index
    %2 = vector.load %arg2[%c0_1, %c0_2] : memref<128x128xbf16, #tpu.memory_space<vmem>>, vector<128x128xbf16>
    %cst = arith.constant dense<0.000000e+00> : vector<8x128xf32>
    %3 = tpu.matmul %1, %2, %cst {dimension_numbers = #tpu.dot_dimension_numbers<[1], [0], [0], [1], [0, 0, 1, 1], [], []>} : vector<8x128xbf16>, vector<128x128xbf16>, vector<8x128xf32> -> vector<8x128xf32>
    %c0_3 = arith.constant 0 : index
    %c0_4 = arith.constant 0 : index
    %4 = vector.load %arg3[%c0_3, %c0_4] : memref<1x128xf32, #tpu.memory_space<vmem>>, vector<1x128xf32>
    %5 = vector.broadcast %4 : vector<1x128xf32> to vector<8x128xf32>
    %6 = arith.addf %3, %5 : vector<8x128xf32>
    %cst_5 = arith.constant 0.000000e+00 : f32
    %7 = vector.broadcast %cst_5 : f32 to vector<8x128xf32>
    %8 = arith.maximumf %6, %7 : vector<8x128xf32>
    %9 = arith.truncf %8 : vector<8x128xf32> to vector<8x128xbf16>
    %c0_6 = arith.constant 0 : index
    %c0_7 = arith.constant 0 : index
    %10 = vector.load %arg4[%c0_6, %c0_7] : memref<128x128xbf16, #tpu.memory_space<vmem>>, vector<128x128xbf16>
    %cst_8 = arith.constant dense<0.000000e+00> : vector<8x128xf32>
    %11 = tpu.matmul %9, %10, %cst_8 {dimension_numbers = #tpu.dot_dimension_numbers<[1], [0], [0], [1], [0, 0, 1, 1], [], []>} : vector<8x128xbf16>, vector<128x128xbf16>, vector<8x128xf32> -> vector<8x128xf32>
    %c0_9 = arith.constant 0 : index
    %c0_10 = arith.constant 0 : index
    %12 = vector.load %arg5[%c0_9, %c0_10] : memref<1x128xf32, #tpu.memory_space<vmem>>, vector<1x128xf32>
    %13 = vector.broadcast %12 : vector<1x128xf32> to vector<8x128xf32>
    %14 = arith.addf %11, %13 : vector<8x128xf32>
    %c0_11 = arith.constant 0 : index
    %c0_12 = arith.constant 0 : index
    %15 = vector.load %arg6[%c0_11, %c0_12] : memref<8x128xf32, #tpu.memory_space<vmem>>, vector<8x128xf32>
    tpu.vector_store %arg6[%c0_11, %c0_12], %14 {strides = array<i32>} : memref<8x128xf32, #tpu.memory_space<vmem>>, vector<8x128xf32>,
    return
  }
  func.func @transform_0(%arg0: i32) -> (i32, i32) {
    %c0_i32 = arith.constant 0 : i32
    %c0_i32_0 = arith.constant 0 : i32
    return %arg0, %c0_i32 : i32, i32
  }
  func.func @transform_1(%arg0: i32) -> (i32, i32) {
    %c0_i32 = arith.constant 0 : i32
    %c0_i32_0 = arith.constant 0 : i32
    %c0_i32_1 = arith.constant 0 : i32
    return %c0_i32, %c0_i32_0 : i32, i32
  }
  func.func @transform_2(%arg0: i32) -> (i32, i32) {
    %c0_i32 = arith.constant 0 : i32
    %c0_i32_0 = arith.constant 0 : i32
    %c0_i32_1 = arith.constant 0 : i32
    return %c0_i32, %c0_i32_0 : i32, i32
  }
  func.func @transform_3(%arg0: i32) -> (i32, i32) {
    %c0_i32 = arith.constant 0 : i32
    %c0_i32_0 = arith.constant 0 : i32
    %c0_i32_1 = arith.constant 0 : i32
    return %c0_i32, %c0_i32_0 : i32, i32
  }
  func.func @transform_4(%arg0: i32) -> (i32, i32) {
    %c0_i32 = arith.constant 0 : i32
    %c0_i32_0 = arith.constant 0 : i32
    %c0_i32_1 = arith.constant 0 : i32
    return %c0_i32, %c0_i32_0 : i32, i32
  }
  func.func @transform_5(%arg0: i32) -> (i32, i32) {
    %c0_i32 = arith.constant 0 : i32
    %c0_i32_0 = arith.constant 0 : i32
    return %arg0, %c0_i32 : i32, i32
  }
}

</mosaic_0001>

<bundles_post_ra>
// kernel: feed_forward.1
= control target key start
LH: loop header
LB: loop body
LE: loop exit
PB: predicated region body
PF: predicated region fallthrough
CT: control target
= control target key end

     0   :  { %10 = vsyncpa [#allocation3], 0  ;;  %s500_s0 = inlined_call_operand.vmem [shape: f32[8,128], index: 0, kind: input, shape index: {}]   ;;  %s501_s1 = inlined_call_operand.hbm [shape: bf16[128,128], index: 1, kind: input, shape index: {}]   ;;  %s502_s2 = inlined_call_operand.vmem [shape: f32[1,128], index: 2, kind: input, shape index: {}]   ;;  %s503_s3 = inlined_call_operand.hbm [shape: bf16[128,128], index: 3, kind: input, shape index: {}]   ;;  %s504_s4 = inlined_call_operand.vmem [shape: f32[1,128], index: 4, kind: input, shape index: {}]   ;;  %s505_s5 = inlined_call_operand.vmem [shape: f32[8,128], index: 5, kind: output, shape index: {}]  }
   0x1   :  { %11 = vsyncpa [#allocation5], 0  ;;  %s428_s18 = smov [#allocation2]   ;;  %s380_s22 = scalar_lea.hbm %s501_s1, 1024 }
   0x2   :  { %s19_s19 = sshll.u32 %s428_s18, 4  ;;  %p381_p0 = scmp.ne.s32.totalorder %s501_s1, %s380_s22  ;;  %s20_s19 = int_to_ptr.vmem [resolvable:$true] %s19_s19 }
   0x3   :  { %p384_p1 = scmp.lt.u32.totalorder %s380_s22, %s501_s1 }
   0x5   :  { %p386_p2 = pnand %p384_p1, %p381_p0 }
   0x7   :  { %389 = shalt.err (!%p386_p2)
}
   0x8   :  { %s390_s27 = scalar_lea.vmem %s20_s19, 1024  ;;  %p395_p4 = scmp.lt.s32.totalorder %s20_s19, %s20_s19 }
   0x9   :  { %p391_p3 = scmp.ne.s32.totalorder %s20_s19, %s390_s27  ;;  %p396_p5 = scmp.lt.s32.totalorder %s390_s27, %s390_s27 }
   0xb   :  { %p397_p6 = por %p396_p5, %p395_p4 }
   0xd   :  { %p398_p7 = pnand %p397_p6, %p391_p3 }
   0xf   :  { %401 = shalt.err (!%p398_p7)
}
  0x10   :  { %s429_s28 = smov 64   ;;  %s430_s29 = smov 4  }
  0x11   :  { %25 = dma.hbm_to_vmem [thread:$0]  %s501_s1, 1024, %s20_s19, [#allocation3], %s429_s28, %s429_s28, %s430_s29  }
  0x12   :  { %s431_s7 = smov [#allocation4]   ;;  %s402_s11 = scalar_lea.hbm %s503_s3, 1024 }
  0x13   :  { %s33_s8 = sshll.u32 %s431_s7, 4  ;;  %p403_p8 = scmp.ne.s32.totalorder %s503_s3, %s402_s11  ;;  %s34_s8 = int_to_ptr.vmem [resolvable:$true] %s33_s8 }
  0x14   :  { %p406_p9 = scmp.lt.u32.totalorder %s402_s11, %s503_s3 }
  0x16   :  { %p408_p10 = pnand %p406_p9, %p403_p8 }
  0x18   :  { %411 = shalt.err (!%p408_p10)
}
  0x19   :  { %s412_s16 = scalar_lea.vmem %s34_s8, 1024  ;;  %p417_p12 = scmp.lt.s32.totalorder %s34_s8, %s34_s8 }
  0x1a   :  { %p413_p11 = scmp.ne.s32.totalorder %s34_s8, %s412_s16  ;;  %p418_p13 = scmp.lt.s32.totalorder %s412_s16, %s412_s16 }
  0x1c   :  { %p419_p0 = por %p418_p13, %p417_p12 }
  0x1e   :  { %p420_p1 = pnand %p419_p0, %p413_p11 }
  0x20   :  { %423 = shalt.err (!%p420_p1)
}
  0x21   :  { %39 = dma.hbm_to_vmem [thread:$0]  %s503_s3, 1024, %s34_s8, [#allocation5], %s429_s28, %s429_s28, %s430_s29  }
  0x22   :  { %424 = dma.done.wait [#allocation3], 1024  }
  0x23   :  { %425 = vsyncadd [#allocation3], 4294966272 }
  0x24   :  { %426 = dma.done.wait [#allocation5], 1024  }
  0x25   :  { %427 = vsyncadd [#allocation5], 4294966272  ;;  %v432_v0 = vmov 0.0   ;;  %vm433_vm0 = vmmov 0   ;;  %v364_v1 = vld [vmem:[#allocation2] sm:$0xff]   ;;  %v365_v2 = vld [vmem:[#allocation2 + $0x8] sm:$0xff]  }
  0x26   :  { %318 = vmatprep.subr.bf16.mxu0 %v432_v0  ;;  %334 = vmatprep.mubr.msk.bf16.mxu0 %vm433_vm0, %v432_v0  ;;  %v366_v3 = vld [vmem:[#allocation2 + $0x10] sm:$0xff]   ;;  %v372_v4 = vld [vmem:[#allocation4] sm:$0xff]   ;;  %v367_v5 = vld [vmem:[#allocation2 + $0x18] sm:$0xff]  }
  0x27   :  { %338 = vmatprep.subr.bf16.mxu1 %v432_v0  ;;  %354 = vmatprep.mubr.msk.bf16.mxu1 %vm433_vm0, %v432_v0  ;;  %v373_v6 = vld [vmem:[#allocation4 + $0x8] sm:$0xff]   ;;  %v368_v7 = vld [vmem:[#allocation2 + $0x20] sm:$0xff]   ;;  %v374_v8 = vld [vmem:[#allocation4 + $0x10] sm:$0xff]  }
  0x28   :  { %319 = vmatpush3.bf16.msra.mxu0 %v364_v1  ;;  %339 = vmatpush3.bf16.msra.mxu1 %v372_v4  ;;  %v369_v9 = vld [vmem:[#allocation2 + $0x28] sm:$0xff]   ;;  %v375_v10 = vld [vmem:[#allocation4 + $0x18] sm:$0xff]   ;;  %v370_v11 = vld [vmem:[#allocation2 + $0x30] sm:$0xff]  }
  0x29   :  { %320 = vmatprep.subr.bf16.mxu0 %v432_v0  ;;  %340 = vmatprep.subr.bf16.mxu1 %v432_v0  ;;  %v376_v12 = vld [vmem:[#allocation4 + $0x20] sm:$0xff]   ;;  %v371_v13 = vld [vmem:[#allocation2 + $0x38] sm:$0xff]   ;;  %v377_v15 = vld [vmem:[#allocation4 + $0x28] sm:$0xff]  }
  0x2a   :  { %v49_v14 = vld [vmem:[%s500_s0] sm:$0xff]  ;;  %v378_v17 = vld [vmem:[#allocation4 + $0x30] sm:$0xff]   ;;  %v379_v18 = vld [vmem:[#allocation4 + $0x38] sm:$0xff]  }
  0x2b   :  { %v50_v16 = vpack.c.bf16 %v49_v14, %v49_v14  ;;  %v282_v19 = vld [vmem:[%s502_s2] ss:$0 sm:$0xff] }
  0x2c   :  { %321 = vmatpush3.bf16.msra.mxu0 %v365_v2  ;;  %341 = vmatpush3.bf16.msra.mxu1 %v373_v6  ;;  %v291_v27 = vld [vmem:[%s504_s4] ss:$0 sm:$0xff] }
  0x2d   :  { %322 = vmatprep.subr.bf16.mxu0 %v432_v0  ;;  %342 = vmatprep.subr.bf16.mxu1 %v432_v0 }
  0x30   :  { %323 = vmatpush3.bf16.msra.mxu0 %v366_v3  ;;  %343 = vmatpush3.bf16.msra.mxu1 %v374_v8 }
  0x31   :  { %324 = vmatprep.subr.bf16.mxu0 %v432_v0  ;;  %344 = vmatprep.subr.bf16.mxu1 %v432_v0 }
  0x34   :  { %325 = vmatpush3.bf16.msra.mxu0 %v367_v5  ;;  %345 = vmatpush3.bf16.msra.mxu1 %v375_v10 }
  0x35   :  { %326 = vmatprep.subr.bf16.mxu0 %v432_v0  ;;  %346 = vmatprep.subr.bf16.mxu1 %v432_v0 }
  0x38   :  { %327 = vmatpush3.bf16.msra.mxu0 %v368_v7  ;;  %347 = vmatpush3.bf16.msra.mxu1 %v376_v12 }
  0x39   :  { %328 = vmatprep.subr.bf16.mxu0 %v432_v0  ;;  %348 = vmatprep.subr.bf16.mxu1 %v432_v0 }
  0x3c   :  { %329 = vmatpush3.bf16.msra.mxu0 %v369_v9  ;;  %349 = vmatpush3.bf16.msra.mxu1 %v377_v15 }
  0x3d   :  { %330 = vmatprep.subr.bf16.mxu0 %v432_v0  ;;  %350 = vmatprep.subr.bf16.mxu1 %v432_v0 }
  0x40   :  { %331 = vmatpush3.bf16.msra.mxu0 %v370_v11  ;;  %351 = vmatpush3.bf16.msra.mxu1 %v378_v17 }
  0x41   :  { %332 = vmatprep.subr.bf16.mxu0 %v432_v0  ;;  %352 = vmatprep.subr.bf16.mxu1 %v432_v0 }
  0x44   :  { %333 = vmatpush3.bf16.msra.mxu0 %v371_v13  ;;  %353 = vmatpush3.bf16.msra.mxu1 %v379_v18 }
  0x47   :  { %335 = vmatmul.mubr.bf16.vlgmr.msra.gmra.mrb[0].mxu0 %v50_v16 }
 0x11a   :  { %v156_v20 = vpop.f32.mrb[0].mxu0 }
 0x11b   :  { %v157_v21 = vadd.f32 %v282_v19, %v156_v20  ;;  %v336_v22 = vpop.f32.mrb[1].mxu0 }
 0x11c   :  { %v159_v23 = vpop.f32.mrb[2].mxu0 }
 0x11d   :  { %v162_v24 = vmax.f32 %v157_v21, 0.0  ;;  %v337_v25 = vpop.f32.mrb[3].mxu0 }
 0x11f   :  { %v163_v26 = vpack.c.bf16 %v162_v24, %v162_v24 }
 0x121   :  { %355 = vmatmul.mubr.bf16.vlgmr.msra.gmra.mrb[0].mxu1 %v163_v26 }
 0x1f4   :  { %v269_v28 = vpop.f32.mrb[0].mxu1 }
 0x1f5   :  { %v270_v29 = vadd.f32 %v291_v27, %v269_v28  ;;  %v356_v30 = vpop.f32.mrb[1].mxu1 }
 0x1f6   :  { %v272_v31 = vpop.f32.mrb[2].mxu1 }
 0x1f7   :  { %275 = vst [vmem:[%s505_s5] sm:$0xff] %v270_v29  ;;  %v357_v32 = vpop.f32.mrb[3].mxu1 }
 0x1f8   :  { %280 = vsyncpa [#allocation3], 1 }
 0x1f9   :  { %281 = vsyncpa [#allocation5], 1 }

</bundles_post_ra>
